<compile_context>
chip_gen: v7x
topology: tpu7x:2x2x1
jax: 0.10.0
libtpu: 0.0.40
codegen_flags: <defaults>
</compile_context>

<pallas_src>
from functools import partial

import jax
import jax.numpy as jnp
from jax.experimental import pallas as pl
from jax.experimental.pallas import tpu as pltpu


# ---------------------------------------------------------------------------
# Fused BasicBlock kernel (one grid step == one batch image).
#   x_ref      : (1, C_in_p, N1)   channel-major, zero-extended, flattened image
#   w1_ref     : (C_mid_p, K*K*C_in_p)  tap-stacked conv1 weight (bf16)
#   b1_ref     : (C_mid_p, 1)           conv1 bias (f32)
#   w2_ref     : (C_out,  K*K*C_mid_p)  tap-stacked conv2 weight (bf16)
#   b2_ref     : (C_out, 1)             conv2 bias (f32)
#   wd_ref/bd  : optional 1x1 downsample weight/bias
#   o_ref      : (1, C_out, M)      lane-dense flat output
#   canvas_ref : (C_mid_p, N2)      conv2's zero-padded input (bf16, VMEM)
#   patch_ref  : (K*K*Cmax, M)      shared im2col patch scratch (bf16, VMEM)
# ---------------------------------------------------------------------------
def _make_block_kernel(*, K, W_ext, Wo, M, N2, stride, canvas_off, res_base,
                       c_in_p, c_mid_p, c_out, scale, has_downsample):
    taps = [(kh, kw) for kh in range(K) for kw in range(K)]
    kk_ci = K * K * c_in_p
    kk_cm = K * K * c_mid_p
    halo_r = N2 - canvas_off - M          # lanes after the scattered region
    inv_w = 1.0 / float(W_ext)
    s = stride

    def kernel(x_ref, w1_ref, b1_ref, w2_ref, b2_ref, *rest):
        if has_downsample:
            wd_ref, bd_ref, o_ref, canvas_ref, patch_ref = rest
        else:
            o_ref, canvas_ref, patch_ref = rest

        def lanes(off):
            # One shifted slab of the flattened image: (C, M), M in lanes.
            if s == 1:
                return x_ref[0, :, pl.ds(off, M)]
            return x_ref[0, :, pl.ds(off, M, stride=s)]

        # Valid-column mask computed in-kernel (lane index mod W_ext < Wo);
        # float-only ops (iota -> f32, floor) for portable lowering.
        col = jax.lax.broadcasted_iota(jnp.int32, (1, M), 1).astype(jnp.float32)
        row = jnp.floor((col + 0.5) * inv_w)
        valid = (col - row * W_ext) < (Wo - 0.5)

        # ---- conv1: gather K*K shifted slabs, then ONE deep-contraction GEMM.
        for t, (kh, kw) in enumerate(taps):
            patch_ref[t * c_in_p:(t + 1) * c_in_p, :] = lanes(kh * W_ext + kw)
        acc1 = jnp.dot(w1_ref[...], patch_ref[0:kk_ci, :],
                       preferred_element_type=jnp.float32)
        y = jnp.maximum(acc1 + b1_ref[...], 0.0)
        y = jnp.where(valid, y, 0.0)      # wrap cols become conv2's zero padding

        # ---- scatter into conv2's zero-padded canvas.  Only the halo slabs
        # need zeroing (done every step: scratch is per-core and never
        # re-initialised, and the batch axis may be megacore-sharded); the
        # interior is fully overwritten below.
        if canvas_off > 0:
            canvas_ref[:, 0:canvas_off] = jnp.zeros(
                (c_mid_p, canvas_off), canvas_ref.dtype)
        canvas_ref[:, canvas_off + M:] = jnp.zeros(
            (c_mid_p, halo_r), canvas_ref.dtype)
        canvas_ref[:, pl.ds(canvas_off, M)] = y.astype(canvas_ref.dtype)

        # ---- conv2 (KxK, stride 1): same gather + one GEMM from the canvas.
        for t, (kh, kw) in enumerate(taps):
            patch_ref[t * c_mid_p:(t + 1) * c_mid_p, :] = (
                canvas_ref[:, pl.ds(kh * W_ext + kw, M)])
        acc2 = jnp.dot(w2_ref[...], patch_ref[0:kk_cm, :],
                       preferred_element_type=jnp.float32) + b2_ref[...]

        # ---- residual branch: 1x1 strided downsample conv, or identity.
        if has_downsample:
            res = jnp.dot(wd_ref[...], lanes(res_base),
                          preferred_element_type=jnp.float32) + bd_ref[...]
        else:
            res = lanes(res_base)[0:c_out].astype(jnp.float32)

        # ---- scaled residual add + last ReLU, lane-dense store.
        o_ref[0] = jnp.maximum(acc2 + scale * res, 0.0).astype(o_ref.dtype)

    return kernel


# ---------------------------------------------------------------------------
# Wrapper: layout prep (pad + flatten, no transposes), pallas_call, extract.
# ---------------------------------------------------------------------------
def basic_block_forward(x_nchw, params, *, kernel_size, stride=1,
                        scaling_factor=1.0):
    B, C_in, H, W = x_nchw.shape
    K = kernel_size
    s = stride
    C_out = params["w1"].shape[0]
    p1 = K // 2
    p2 = K // 2
    Ho = (H + 2 * p1 - K) // s + 1
    Wo = (W + 2 * p1 - K) // s + 1
    W_ext = max(W + 2 * p1, Wo + 2 * p2)   # common extended row width
    H1_ext = s * Ho + K                    # extended rows of conv1 / ds input
    N1 = H1_ext * W_ext                    # flat lanes per input image
    M = Ho * W_ext                         # flat output lanes per image
    N2 = (Ho + K) * W_ext                  # canvas lanes (conv2 stride-1 input)
    canvas_off = p2 * W_ext + p2           # where conv1's (0,0) output lands
    res_base = p1 * W_ext + p1             # flat offset of original pixel (0,0)
    has_ds = (s != 1) or (C_in != C_out)

    # Channel padding to a multiple of 16 (bf16 packed (16,128) tiles) keeps
    # every patch / canvas store tile-aligned.
    def rup(v, m):
        return (v + m - 1) // m * m

    C_in_p = rup(C_in, 16)
    C_mid_p = rup(C_out, 16)
    KK_max = K * K * max(C_in_p, C_mid_p)

    # NCHW is already channel-major: pad channels + spatial and flatten — no
    # transpose needed in or out.  bf16 halves x's HBM/DMA bytes.
    x_ext = jnp.pad(x_nchw.astype(jnp.bfloat16),
                    ((0, 0),
                     (0, C_in_p - C_in),
                     (p1, H1_ext - H - p1),
                     (p1, W_ext - W - p1)))
    x_flat = x_ext.reshape(B, C_in_p, N1)

    def stack_taps(w, ci_pad):
        # torch OIHW -> (O, K*K*ci_pad); row ordering t*ci_pad + c with
        # t = kh*K + kw, matching the kernel's patch gather.
        o, i, kh, kw = w.shape
        w = jnp.pad(w, ((0, 0), (0, ci_pad - i), (0, 0), (0, 0)))
        return jnp.transpose(w, (0, 2, 3, 1)).reshape(
            o, kh * kw * ci_pad).astype(jnp.bfloat16)

    w1_padded = jnp.pad(params["w1"],
                        ((0, C_mid_p - C_out), (0, 0), (0, 0), (0, 0)))
    w1_k = stack_taps(w1_padded, C_in_p)                    # (C_mid_p, K*K*C_in_p)
    b1_k = jnp.pad(params["b1"], (0, C_mid_p - C_out)).reshape(
        C_mid_p, 1).astype(jnp.float32)
    w2_k = stack_taps(params["w2"], C_mid_p)                # (C_out, K*K*C_mid_p)
    b2_k = params["b2"].reshape(C_out, 1).astype(jnp.float32)

    inputs = [x_flat, w1_k, b1_k, w2_k, b2_k]
    in_specs = [
        pl.BlockSpec((1, C_in_p, N1), lambda b: (b, 0, 0)),
        pl.BlockSpec((C_mid_p, K * K * C_in_p), lambda b: (0, 0)),
        pl.BlockSpec((C_mid_p, 1), lambda b: (0, 0)),
        pl.BlockSpec((C_out, K * K * C_mid_p), lambda b: (0, 0)),
        pl.BlockSpec((C_out, 1), lambda b: (0, 0)),
    ]
    if has_ds:
        wd_k = jnp.pad(params["wd"][:, :, 0, 0],
                       ((0, 0), (0, C_in_p - C_in))).astype(jnp.bfloat16)
        bd_k = params["bd"].reshape(C_out, 1).astype(jnp.float32)
        inputs += [wd_k, bd_k]
        in_specs += [pl.BlockSpec((C_out, C_in_p), lambda b: (0, 0)),
                     pl.BlockSpec((C_out, 1), lambda b: (0, 0))]

    kernel = _make_block_kernel(
        K=K, W_ext=W_ext, Wo=Wo, M=M, N2=N2, stride=s,
        canvas_off=canvas_off, res_base=res_base,
        c_in_p=C_in_p, c_mid_p=C_mid_p, c_out=C_out,
        scale=float(scaling_factor), has_downsample=has_ds)

    # Explicit scoped-VMEM budget (v5e default is only 16 MiB), capped at the
    # v7x physical 64 MiB.
    vmem_bytes = (2 * C_in_p * N1 * 2          # x block, double-buffered (bf16)
                  + 2 * C_out * M * 4          # out block, double-buffered (f32)
                  + C_mid_p * N2 * 2           # canvas scratch (bf16)
                  + KK_max * M * 2             # patch scratch (bf16)
                  + 2 * (1 << 20))             # weights / biases / headroom
    vmem_limit = int(min(max(vmem_bytes, 32 * (1 << 20)), 64 * (1 << 20)))

    out_flat = pl.pallas_call(
        kernel,
        out_shape=jax.ShapeDtypeStruct((B, C_out, M), jnp.float32),
        grid_spec=pltpu.PrefetchScalarGridSpec(
            num_scalar_prefetch=0,
            grid=(B,),
            in_specs=in_specs,
            out_specs=pl.BlockSpec((1, C_out, M), lambda b: (b, 0, 0)),
            scratch_shapes=[pltpu.VMEM((C_mid_p, N2), jnp.bfloat16),
                            pltpu.VMEM((KK_max, M), jnp.bfloat16)],
        ),
        compiler_params=pltpu.CompilerParams(
            dimension_semantics=("parallel",),
            vmem_limit_bytes=vmem_limit),
    )(*inputs)

    # Drop the wrap-around garbage columns; the result is already NCHW.
    return out_flat.reshape(B, C_out, Ho, W_ext)[:, :, :, :Wo]


# ---------------------------------------------------------------------------
# Pure-JAX reference (matches the PyTorch module with default arguments).
# ---------------------------------------------------------------------------
def ref_basic_block(x_nchw, params, *, kernel_size, stride, scaling_factor):
    p = kernel_size // 2

    def conv(x, w, b, s, pad):
        y = jax.lax.conv_general_dilated(
            x, w, window_strides=(s, s), padding=[(pad, pad), (pad, pad)],
            dimension_numbers=("NCHW", "OIHW", "NCHW"),
            precision=jax.lax.Precision.HIGHEST)
        return y + b.reshape(1, -1, 1, 1)

    out = jax.nn.relu(conv(x_nchw, params["w1"], params["b1"], stride, p))
    out = conv(out, params["w2"], params["b2"], 1, p)
    if "wd" in params:
        residual = conv(x_nchw, params["wd"], params["bd"], stride, 0)
    else:
        residual = x_nchw
    return jax.nn.relu(out + residual * scaling_factor)


if __name__ == "__main__":
    key = jax.random.PRNGKey(0)
    k_x, k_w1, k_b1, k_w2, k_b2, k_wd, k_bd = jax.random.split(key, 7)

    # Small config consistent with the module: BasicBlock(4, 8, 3, stride=1);
    # in_channels != out_channels triggers the 1x1 downsample branch.
    B, C_IN, H, W = 2, 4, 16, 16
    C_OUT, K, STRIDE, SCALE = 8, 3, 1, 0.8

    def winit(k, shape):
        fan_in = shape[1] * shape[2] * shape[3]
        return jax.random.normal(k, shape, jnp.float32) / jnp.sqrt(float(fan_in))

    params = {
        "w1": winit(k_w1, (C_OUT, C_IN, K, K)),
        "b1": 0.05 * jax.random.normal(k_b1, (C_OUT,), jnp.float32),
        "w2": winit(k_w2, (C_OUT, C_OUT, K, K)),
        "b2": 0.05 * jax.random.normal(k_b2, (C_OUT,), jnp.float32),
        "wd": winit(k_wd, (C_OUT, C_IN, 1, 1)),   # downsample: 1x1, stride s
        "bd": 0.05 * jax.random.normal(k_bd, (C_OUT,), jnp.float32),
    }

    x = jax.random.normal(k_x, (B, C_IN, H, W), jnp.float32)

    fwd = jax.jit(partial(basic_block_forward, kernel_size=K, stride=STRIDE,
                          scaling_factor=SCALE))
    out = fwd(x, params)
    out = jax.block_until_ready(out)

    ref = ref_basic_block(x, params, kernel_size=K, stride=STRIDE,
                          scaling_factor=SCALE)

    assert out.shape == (B, C_OUT, H, W), out.shape
    # bf16 MXU operands (vs. f32 HIGHEST-precision reference) -> relaxed tol.
    assert jnp.allclose(out, ref, atol=2.5e-2, rtol=2.5e-2), \
        float(jnp.max(jnp.abs(out - ref)))

    print("KERNEL_OK")
</pallas_src>

<mosaic_0001>
module attributes {stable_mosaic.version = 11 : i64} {
  func.func @kernel(%arg0: i32, %arg1: memref<1x16x342xbf16, #tpu.memory_space<vmem>>, %arg2: memref<16x144xbf16, #tpu.memory_space<vmem>>, %arg3: memref<16x1xf32, #tpu.memory_space<vmem>>, %arg4: memref<8x144xbf16, #tpu.memory_space<vmem>>, %arg5: memref<8x1xf32, #tpu.memory_space<vmem>>, %arg6: memref<8x16xbf16, #tpu.memory_space<vmem>>, %arg7: memref<8x1xf32, #tpu.memory_space<vmem>>, %arg8: memref<1x8x288xf32, #tpu.memory_space<vmem>>, %arg9: memref<16x342xbf16, #tpu.memory_space<vmem>>, %arg10: memref<144x288xbf16, #tpu.memory_space<vmem>>) attributes {dimension_semantics = [#tpu.dimension_semantics<parallel>], iteration_bounds = array<i64: 2>, scalar_prefetch = 0 : i64, scratch_operands = 2 : i64, tpu.core_type = #tpu.core_type<tc>, window_params = [{transform_indices = @transform_0, window_bounds = array<i64: 1, 16, 342>}, {pipeline_mode = #tpu.pipeline_mode<synchronous>, transform_indices = @transform_1, window_bounds = array<i64: 16, 144>}, {pipeline_mode = #tpu.pipeline_mode<synchronous>, transform_indices = @transform_2, window_bounds = array<i64: 16, 1>}, {pipeline_mode = #tpu.pipeline_mode<synchronous>, transform_indices = @transform_3, window_bounds = array<i64: 8, 144>}, {pipeline_mode = #tpu.pipeline_mode<synchronous>, transform_indices = @transform_4, window_bounds = array<i64: 8, 1>}, {pipeline_mode = #tpu.pipeline_mode<synchronous>, transform_indices = @transform_5, window_bounds = array<i64: 8, 16>}, {pipeline_mode = #tpu.pipeline_mode<synchronous>, transform_indices = @transform_6, window_bounds = array<i64: 8, 1>}, {transform_indices = @transform_7, window_bounds = array<i64: 1, 8, 288>}]} {
    %0 = tpu.iota {dimensions = array<i32: 1>} : vector<1x288xi32>
    %1 = arith.sitofp %0 : vector<1x288xi32> to vector<1x288xf32>
    %cst = arith.constant 5.000000e-01 : f32
    %2 = vector.broadcast %cst : f32 to vector<1x288xf32>
    %3 = arith.addf %1, %2 : vector<1x288xf32>
    %cst_0 = arith.constant 0.055555556 : f32
    %4 = vector.broadcast %cst_0 : f32 to vector<1x288xf32>
    %5 = arith.mulf %3, %4 : vector<1x288xf32>
    %6 = math.floor %5 : vector<1x288xf32>
    %cst_1 = arith.constant 1.800000e+01 : f32
    %7 = vector.broadcast %cst_1 : f32 to vector<1x288xf32>
    %8 = arith.mulf %6, %7 : vector<1x288xf32>
    %9 = arith.subf %1, %8 : vector<1x288xf32>
    %cst_2 = arith.constant 1.550000e+01 : f32
    %10 = vector.broadcast %cst_2 : f32 to vector<1x288xf32>
    %11 = arith.cmpf olt, %9, %10 : vector<1x288xf32>
    %c0 = arith.constant 0 : index
    %c0_3 = arith.constant 0 : index
    %c0_4 = arith.constant 0 : index
    %12 = vector.load %arg1[%c0, %c0_3, %c0_4] : memref<1x16x342xbf16, #tpu.memory_space<vmem>>, vector<1x16x288xbf16>
    %13 = vector.shape_cast %12 : vector<1x16x288xbf16> to vector<16x288xbf16>
    %c0_5 = arith.constant 0 : index
    %c0_6 = arith.constant 0 : index
    %14 = vector.load %arg10[%c0_5, %c0_6] : memref<144x288xbf16, #tpu.memory_space<vmem>>, vector<16x288xbf16>
    tpu.vector_store %arg10[%c0_5, %c0_6], %13 {strides = array<i32>} : memref<144x288xbf16, #tpu.memory_space<vmem>>, vector<16x288xbf16>,
    %c0_7 = arith.constant 0 : index
    %c0_8 = arith.constant 0 : index
    %c1 = arith.constant 1 : index
    %15 = vector.load %arg1[%c0_7, %c0_8, %c1] : memref<1x16x342xbf16, #tpu.memory_space<vmem>>, vector<1x16x288xbf16>
    %16 = vector.shape_cast %15 : vector<1x16x288xbf16> to vector<16x288xbf16>
    %c16 = arith.constant 16 : index
    %c0_9 = arith.constant 0 : index
    %17 = vector.load %arg10[%c16, %c0_9] : memref<144x288xbf16, #tpu.memory_space<vmem>>, vector<16x288xbf16>
    tpu.vector_store %arg10[%c16, %c0_9], %16 {strides = array<i32>} : memref<144x288xbf16, #tpu.memory_space<vmem>>, vector<16x288xbf16>,
    %c0_10 = arith.constant 0 : index
    %c0_11 = arith.constant 0 : index
    %c2 = arith.constant 2 : index
    %18 = vector.load %arg1[%c0_10, %c0_11, %c2] : memref<1x16x342xbf16, #tpu.memory_space<vmem>>, vector<1x16x288xbf16>
    %19 = vector.shape_cast %18 : vector<1x16x288xbf16> to vector<16x288xbf16>
    %c32 = arith.constant 32 : index
    %c0_12 = arith.constant 0 : index
    %20 = vector.load %arg10[%c32, %c0_12] : memref<144x288xbf16, #tpu.memory_space<vmem>>, vector<16x288xbf16>
    tpu.vector_store %arg10[%c32, %c0_12], %19 {strides = array<i32>} : memref<144x288xbf16, #tpu.memory_space<vmem>>, vector<16x288xbf16>,
    %c0_13 = arith.constant 0 : index
    %c0_14 = arith.constant 0 : index
    %c18 = arith.constant 18 : index
    %21 = vector.load %arg1[%c0_13, %c0_14, %c18] : memref<1x16x342xbf16, #tpu.memory_space<vmem>>, vector<1x16x288xbf16>
    %22 = vector.shape_cast %21 : vector<1x16x288xbf16> to vector<16x288xbf16>
    %c48 = arith.constant 48 : index
    %c0_15 = arith.constant 0 : index
    %23 = vector.load %arg10[%c48, %c0_15] : memref<144x288xbf16, #tpu.memory_space<vmem>>, vector<16x288xbf16>
    tpu.vector_store %arg10[%c48, %c0_15], %22 {strides = array<i32>} : memref<144x288xbf16, #tpu.memory_space<vmem>>, vector<16x288xbf16>,
    %c0_16 = arith.constant 0 : index
    %c0_17 = arith.constant 0 : index
    %c19 = arith.constant 19 : index
    %24 = vector.load %arg1[%c0_16, %c0_17, %c19] : memref<1x16x342xbf16, #tpu.memory_space<vmem>>, vector<1x16x288xbf16>
    %25 = vector.shape_cast %24 : vector<1x16x288xbf16> to vector<16x288xbf16>
    %c64 = arith.constant 64 : index
    %c0_18 = arith.constant 0 : index
    %26 = vector.load %arg10[%c64, %c0_18] : memref<144x288xbf16, #tpu.memory_space<vmem>>, vector<16x288xbf16>
    tpu.vector_store %arg10[%c64, %c0_18], %25 {strides = array<i32>} : memref<144x288xbf16, #tpu.memory_space<vmem>>, vector<16x288xbf16>,
    %c0_19 = arith.constant 0 : index
    %c0_20 = arith.constant 0 : index
    %c20 = arith.constant 20 : index
    %27 = vector.load %arg1[%c0_19, %c0_20, %c20] : memref<1x16x342xbf16, #tpu.memory_space<vmem>>, vector<1x16x288xbf16>
    %28 = vector.shape_cast %27 : vector<1x16x288xbf16> to vector<16x288xbf16>
    %c80 = arith.constant 80 : index
    %c0_21 = arith.constant 0 : index
    %29 = vector.load %arg10[%c80, %c0_21] : memref<144x288xbf16, #tpu.memory_space<vmem>>, vector<16x288xbf16>
    tpu.vector_store %arg10[%c80, %c0_21], %28 {strides = array<i32>} : memref<144x288xbf16, #tpu.memory_space<vmem>>, vector<16x288xbf16>,
    %c0_22 = arith.constant 0 : index
    %c0_23 = arith.constant 0 : index
    %c36 = arith.constant 36 : index
    %30 = vector.load %arg1[%c0_22, %c0_23, %c36] : memref<1x16x342xbf16, #tpu.memory_space<vmem>>, vector<1x16x288xbf16>
    %31 = vector.shape_cast %30 : vector<1x16x288xbf16> to vector<16x288xbf16>
    %c96 = arith.constant 96 : index
    %c0_24 = arith.constant 0 : index
    %32 = vector.load %arg10[%c96, %c0_24] : memref<144x288xbf16, #tpu.memory_space<vmem>>, vector<16x288xbf16>
    tpu.vector_store %arg10[%c96, %c0_24], %31 {strides = array<i32>} : memref<144x288xbf16, #tpu.memory_space<vmem>>, vector<16x288xbf16>,
    %c0_25 = arith.constant 0 : index
    %c0_26 = arith.constant 0 : index
    %c37 = arith.constant 37 : index
    %33 = vector.load %arg1[%c0_25, %c0_26, %c37] : memref<1x16x342xbf16, #tpu.memory_space<vmem>>, vector<1x16x288xbf16>
    %34 = vector.shape_cast %33 : vector<1x16x288xbf16> to vector<16x288xbf16>
    %c112 = arith.constant 112 : index
    %c0_27 = arith.constant 0 : index
    %35 = vector.load %arg10[%c112, %c0_27] : memref<144x288xbf16, #tpu.memory_space<vmem>>, vector<16x288xbf16>
    tpu.vector_store %arg10[%c112, %c0_27], %34 {strides = array<i32>} : memref<144x288xbf16, #tpu.memory_space<vmem>>, vector<16x288xbf16>,
    %c0_28 = arith.constant 0 : index
    %c0_29 = arith.constant 0 : index
    %c38 = arith.constant 38 : index
    %36 = vector.load %arg1[%c0_28, %c0_29, %c38] : memref<1x16x342xbf16, #tpu.memory_space<vmem>>, vector<1x16x288xbf16>
    %37 = vector.shape_cast %36 : vector<1x16x288xbf16> to vector<16x288xbf16>
    %c128 = arith.constant 128 : index
    %c0_30 = arith.constant 0 : index
    %38 = vector.load %arg10[%c128, %c0_30] : memref<144x288xbf16, #tpu.memory_space<vmem>>, vector<16x288xbf16>
    tpu.vector_store %arg10[%c128, %c0_30], %37 {strides = array<i32>} : memref<144x288xbf16, #tpu.memory_space<vmem>>, vector<16x288xbf16>,
    %c0_31 = arith.constant 0 : index
    %c0_32 = arith.constant 0 : index
    %39 = vector.load %arg2[%c0_31, %c0_32] : memref<16x144xbf16, #tpu.memory_space<vmem>>, vector<16x144xbf16>
    %c0_33 = arith.constant 0 : index
    %c0_34 = arith.constant 0 : index
    %40 = vector.load %arg10[%c0_33, %c0_34] : memref<144x288xbf16, #tpu.memory_space<vmem>>, vector<144x288xbf16>
    %cst_35 = arith.constant dense<0.000000e+00> : vector<16x288xf32>
    %41 = tpu.matmul %39, %40, %cst_35 {dimension_numbers = #tpu.dot_dimension_numbers<[1], [0], [0], [1], [0, 0, 1, 1], [], []>} : vector<16x144xbf16>, vector<144x288xbf16>, vector<16x288xf32> -> vector<16x288xf32>
    %c0_36 = arith.constant 0 : index
    %c0_37 = arith.constant 0 : index
    %42 = vector.load %arg3[%c0_36, %c0_37] : memref<16x1xf32, #tpu.memory_space<vmem>>, vector<16x1xf32>
    %43 = vector.broadcast %42 : vector<16x1xf32> to vector<16x288xf32>
    %44 = arith.addf %41, %43 : vector<16x288xf32>
    %cst_38 = arith.constant 0.000000e+00 : f32
    %45 = vector.broadcast %cst_38 : f32 to vector<16x288xf32>
    %46 = arith.maximumf %44, %45 : vector<16x288xf32>
    %cst_39 = arith.constant 0.000000e+00 : f32
    %47 = vector.shape_cast %11 : vector<1x288xi1> to vector<1x288xi1>
    %48 = vector.broadcast %47 : vector<1x288xi1> to vector<16x288xi1>
    %49 = vector.broadcast %cst_39 : f32 to vector<16x288xf32>
    %50 = arith.select %48, %46, %49 : vector<16x288xi1>, vector<16x288xf32>
    %cst_40 = arith.constant 0.000000e+00 : bf16
    %51 = vector.broadcast %cst_40 : bf16 to vector<16x19xbf16>
    %c0_41 = arith.constant 0 : index
    %c0_42 = arith.constant 0 : index
    %52 = vector.load %arg9[%c0_41, %c0_42] : memref<16x342xbf16, #tpu.memory_space<vmem>>, vector<16x19xbf16>
    tpu.vector_store %arg9[%c0_41, %c0_42], %51 {strides = array<i32>} : memref<16x342xbf16, #tpu.memory_space<vmem>>, vector<16x19xbf16>,
    %cst_43 = arith.constant 0.000000e+00 : bf16
    %53 = vector.broadcast %cst_43 : bf16 to vector<16x35xbf16>
    %c0_44 = arith.constant 0 : index
    %c307 = arith.constant 307 : index
    %54 = vector.load %arg9[%c0_44, %c307] : memref<16x342xbf16, #tpu.memory_space<vmem>>, vector<16x35xbf16>
    tpu.vector_store %arg9[%c0_44, %c307], %53 {strides = array<i32>} : memref<16x342xbf16, #tpu.memory_space<vmem>>, vector<16x35xbf16>,
    %55 = arith.truncf %50 : vector<16x288xf32> to vector<16x288xbf16>
    %c0_45 = arith.constant 0 : index
    %c19_46 = arith.constant 19 : index
    %56 = vector.load %arg9[%c0_45, %c19_46] : memref<16x342xbf16, #tpu.memory_space<vmem>>, vector<16x288xbf16>
    tpu.vector_store %arg9[%c0_45, %c19_46], %55 {strides = array<i32>} : memref<16x342xbf16, #tpu.memory_space<vmem>>, vector<16x288xbf16>,
    %c0_47 = arith.constant 0 : index
    %c0_48 = arith.constant 0 : index
    %57 = vector.load %arg9[%c0_47, %c0_48] : memref<16x342xbf16, #tpu.memory_space<vmem>>, vector<16x288xbf16>
    %c0_49 = arith.constant 0 : index
    %c0_50 = arith.constant 0 : index
    %58 = vector.load %arg10[%c0_49, %c0_50] : memref<144x288xbf16, #tpu.memory_space<vmem>>, vector<16x288xbf16>
    tpu.vector_store %arg10[%c0_49, %c0_50], %57 {strides = array<i32>} : memref<144x288xbf16, #tpu.memory_space<vmem>>, vector<16x288xbf16>,
    %c0_51 = arith.constant 0 : index
    %c1_52 = arith.constant 1 : index
    %59 = vector.load %arg9[%c0_51, %c1_52] : memref<16x342xbf16, #tpu.memory_space<vmem>>, vector<16x288xbf16>
    %c16_53 = arith.constant 16 : index
    %c0_54 = arith.constant 0 : index
    %60 = vector.load %arg10[%c16_53, %c0_54] : memref<144x288xbf16, #tpu.memory_space<vmem>>, vector<16x288xbf16>
    tpu.vector_store %arg10[%c16_53, %c0_54], %59 {strides = array<i32>} : memref<144x288xbf16, #tpu.memory_space<vmem>>, vector<16x288xbf16>,
    %c0_55 = arith.constant 0 : index
    %c2_56 = arith.constant 2 : index
    %61 = vector.load %arg9[%c0_55, %c2_56] : memref<16x342xbf16, #tpu.memory_space<vmem>>, vector<16x288xbf16>
    %c32_57 = arith.constant 32 : index
    %c0_58 = arith.constant 0 : index
    %62 = vector.load %arg10[%c32_57, %c0_58] : memref<144x288xbf16, #tpu.memory_space<vmem>>, vector<16x288xbf16>
    tpu.vector_store %arg10[%c32_57, %c0_58], %61 {strides = array<i32>} : memref<144x288xbf16, #tpu.memory_space<vmem>>, vector<16x288xbf16>,
    %c0_59 = arith.constant 0 : index
    %c18_60 = arith.constant 18 : index
    %63 = vector.load %arg9[%c0_59, %c18_60] : memref<16x342xbf16, #tpu.memory_space<vmem>>, vector<16x288xbf16>
    %c48_61 = arith.constant 48 : index
    %c0_62 = arith.constant 0 : index
    %64 = vector.load %arg10[%c48_61, %c0_62] : memref<144x288xbf16, #tpu.memory_space<vmem>>, vector<16x288xbf16>
    tpu.vector_store %arg10[%c48_61, %c0_62], %63 {strides = array<i32>} : memref<144x288xbf16, #tpu.memory_space<vmem>>, vector<16x288xbf16>,
    %c0_63 = arith.constant 0 : index
    %c19_64 = arith.constant 19 : index
    %65 = vector.load %arg9[%c0_63, %c19_64] : memref<16x342xbf16, #tpu.memory_space<vmem>>, vector<16x288xbf16>
    %c64_65 = arith.constant 64 : index
    %c0_66 = arith.constant 0 : index
    %66 = vector.load %arg10[%c64_65, %c0_66] : memref<144x288xbf16, #tpu.memory_space<vmem>>, vector<16x288xbf16>
    tpu.vector_store %arg10[%c64_65, %c0_66], %65 {strides = array<i32>} : memref<144x288xbf16, #tpu.memory_space<vmem>>, vector<16x288xbf16>,
    %c0_67 = arith.constant 0 : index
    %c20_68 = arith.constant 20 : index
    %67 = vector.load %arg9[%c0_67, %c20_68] : memref<16x342xbf16, #tpu.memory_space<vmem>>, vector<16x288xbf16>
    %c80_69 = arith.constant 80 : index
    %c0_70 = arith.constant 0 : index
    %68 = vector.load %arg10[%c80_69, %c0_70] : memref<144x288xbf16, #tpu.memory_space<vmem>>, vector<16x288xbf16>
    tpu.vector_store %arg10[%c80_69, %c0_70], %67 {strides = array<i32>} : memref<144x288xbf16, #tpu.memory_space<vmem>>, vector<16x288xbf16>,
    %c0_71 = arith.constant 0 : index
    %c36_72 = arith.constant 36 : index
    %69 = vector.load %arg9[%c0_71, %c36_72] : memref<16x342xbf16, #tpu.memory_space<vmem>>, vector<16x288xbf16>
    %c96_73 = arith.constant 96 : index
    %c0_74 = arith.constant 0 : index
    %70 = vector.load %arg10[%c96_73, %c0_74] : memref<144x288xbf16, #tpu.memory_space<vmem>>, vector<16x288xbf16>
    tpu.vector_store %arg10[%c96_73, %c0_74], %69 {strides = array<i32>} : memref<144x288xbf16, #tpu.memory_space<vmem>>, vector<16x288xbf16>,
    %c0_75 = arith.constant 0 : index
    %c37_76 = arith.constant 37 : index
    %71 = vector.load %arg9[%c0_75, %c37_76] : memref<16x342xbf16, #tpu.memory_space<vmem>>, vector<16x288xbf16>
    %c112_77 = arith.constant 112 : index
    %c0_78 = arith.constant 0 : index
    %72 = vector.load %arg10[%c112_77, %c0_78] : memref<144x288xbf16, #tpu.memory_space<vmem>>, vector<16x288xbf16>
    tpu.vector_store %arg10[%c112_77, %c0_78], %71 {strides = array<i32>} : memref<144x288xbf16, #tpu.memory_space<vmem>>, vector<16x288xbf16>,
    %c0_79 = arith.constant 0 : index
    %c38_80 = arith.constant 38 : index
    %73 = vector.load %arg9[%c0_79, %c38_80] : memref<16x342xbf16, #tpu.memory_space<vmem>>, vector<16x288xbf16>
    %c128_81 = arith.constant 128 : index
    %c0_82 = arith.constant 0 : index
    %74 = vector.load %arg10[%c128_81, %c0_82] : memref<144x288xbf16, #tpu.memory_space<vmem>>, vector<16x288xbf16>
    tpu.vector_store %arg10[%c128_81, %c0_82], %73 {strides = array<i32>} : memref<144x288xbf16, #tpu.memory_space<vmem>>, vector<16x288xbf16>,
    %c0_83 = arith.constant 0 : index
    %c0_84 = arith.constant 0 : index
    %75 = vector.load %arg4[%c0_83, %c0_84] : memref<8x144xbf16, #tpu.memory_space<vmem>>, vector<8x144xbf16>
    %c0_85 = arith.constant 0 : index
    %c0_86 = arith.constant 0 : index
    %76 = vector.load %arg10[%c0_85, %c0_86] : memref<144x288xbf16, #tpu.memory_space<vmem>>, vector<144x288xbf16>
    %cst_87 = arith.constant dense<0.000000e+00> : vector<8x288xf32>
    %77 = tpu.matmul %75, %76, %cst_87 {dimension_numbers = #tpu.dot_dimension_numbers<[1], [0], [0], [1], [0, 0, 1, 1], [], []>} : vector<8x144xbf16>, vector<144x288xbf16>, vector<8x288xf32> -> vector<8x288xf32>
    %c0_88 = arith.constant 0 : index
    %c0_89 = arith.constant 0 : index
    %78 = vector.load %arg5[%c0_88, %c0_89] : memref<8x1xf32, #tpu.memory_space<vmem>>, vector<8x1xf32>
    %79 = vector.broadcast %78 : vector<8x1xf32> to vector<8x288xf32>
    %80 = arith.addf %77, %79 : vector<8x288xf32>
    %c0_90 = arith.constant 0 : index
    %c0_91 = arith.constant 0 : index
    %81 = vector.load %arg6[%c0_90, %c0_91] : memref<8x16xbf16, #tpu.memory_space<vmem>>, vector<8x16xbf16>
    %c0_92 = arith.constant 0 : index
    %c0_93 = arith.constant 0 : index
    %c19_94 = arith.constant 19 : index
    %82 = vector.load %arg1[%c0_92, %c0_93, %c19_94] : memref<1x16x342xbf16, #tpu.memory_space<vmem>>, vector<1x16x288xbf16>
    %83 = vector.shape_cast %82 : vector<1x16x288xbf16> to vector<16x288xbf16>
    %cst_95 = arith.constant dense<0.000000e+00> : vector<8x288xf32>
    %84 = tpu.matmul %81, %83, %cst_95 {dimension_numbers = #tpu.dot_dimension_numbers<[1], [0], [0], [1], [0, 0, 1, 1], [], []>} : vector<8x16xbf16>, vector<16x288xbf16>, vector<8x288xf32> -> vector<8x288xf32>
    %c0_96 = arith.constant 0 : index
    %c0_97 = arith.constant 0 : index
    %85 = vector.load %arg7[%c0_96, %c0_97] : memref<8x1xf32, #tpu.memory_space<vmem>>, vector<8x1xf32>
    %86 = vector.broadcast %85 : vector<8x1xf32> to vector<8x288xf32>
    %87 = arith.addf %84, %86 : vector<8x288xf32>
    %cst_98 = arith.constant 8.000000e-01 : f32
    %88 = vector.broadcast %cst_98 : f32 to vector<8x288xf32>
    %89 = arith.mulf %88, %87 : vector<8x288xf32>
    %90 = arith.addf %80, %89 : vector<8x288xf32>
    %cst_99 = arith.constant 0.000000e+00 : f32
    %91 = vector.broadcast %cst_99 : f32 to vector<8x288xf32>
    %92 = arith.maximumf %90, %91 : vector<8x288xf32>
    %c0_100 = arith.constant 0 : index
    %c0_101 = arith.constant 0 : index
    %c0_102 = arith.constant 0 : index
    %93 = vector.load %arg8[%c0_100, %c0_101, %c0_102] : memref<1x8x288xf32, #tpu.memory_space<vmem>>, vector<1x8x288xf32>
    %94 = vector.shape_cast %93 : vector<1x8x288xf32> to vector<8x288xf32>
    %95 = vector.shape_cast %92 : vector<8x288xf32> to vector<1x8x288xf32>
    tpu.vector_store %arg8[%c0_100, %c0_101, %c0_102], %95 {strides = array<i32>} : memref<1x8x288xf32, #tpu.memory_space<vmem>>, vector<1x8x288xf32>,
    return
  }
  func.func @transform_0(%arg0: i32) -> (i32, i32, i32) {
    %c0_i32 = arith.constant 0 : i32
    %c0_i32_0 = arith.constant 0 : i32
    %c0_i32_1 = arith.constant 0 : i32
    return %arg0, %c0_i32, %c0_i32_0 : i32, i32, i32
  }
  func.func @transform_1(%arg0: i32) -> (i32, i32) {
    %c0_i32 = arith.constant 0 : i32
    %c0_i32_0 = arith.constant 0 : i32
    %c0_i32_1 = arith.constant 0 : i32
    return %c0_i32, %c0_i32_0 : i32, i32
  }
  func.func @transform_2(%arg0: i32) -> (i32, i32) {
    %c0_i32 = arith.constant 0 : i32
    %c0_i32_0 = arith.constant 0 : i32
    %c0_i32_1 = arith.constant 0 : i32
    return %c0_i32, %c0_i32_0 : i32, i32
  }
  func.func @transform_3(%arg0: i32) -> (i32, i32) {
    %c0_i32 = arith.constant 0 : i32
    %c0_i32_0 = arith.constant 0 : i32
    %c0_i32_1 = arith.constant 0 : i32
    return %c0_i32, %c0_i32_0 : i32, i32
  }
  func.func @transform_4(%arg0: i32) -> (i32, i32) {
    %c0_i32 = arith.constant 0 : i32
    %c0_i32_0 = arith.constant 0 : i32
    %c0_i32_1 = arith.constant 0 : i32
    return %c0_i32, %c0_i32_0 : i32, i32
  }
  func.func @transform_5(%arg0: i32) -> (i32, i32) {
    %c0_i32 = arith.constant 0 : i32
    %c0_i32_0 = arith.constant 0 : i32
    %c0_i32_1 = arith.constant 0 : i32
    return %c0_i32, %c0_i32_0 : i32, i32
  }
  func.func @transform_6(%arg0: i32) -> (i32, i32) {
    %c0_i32 = arith.constant 0 : i32
    %c0_i32_0 = arith.constant 0 : i32
    %c0_i32_1 = arith.constant 0 : i32
    return %c0_i32, %c0_i32_0 : i32, i32
  }
  func.func @transform_7(%arg0: i32) -> (i32, i32, i32) {
    %c0_i32 = arith.constant 0 : i32
    %c0_i32_0 = arith.constant 0 : i32
    %c0_i32_1 = arith.constant 0 : i32
    return %arg0, %c0_i32, %c0_i32_0 : i32, i32, i32
  }
}

</mosaic_0001>

<bundles_post_ra>
// kernel: basic_block_forward.1
= control target key start
LH: loop header
LB: loop body
LE: loop exit
PB: predicated region body
PF: predicated region fallthrough
CT: control target
= control target key end

     0   :  { %s1402_s24 = smov 0   ;;  %s1630_s0 = inlined_call_operand.vmem [shape: bf16[2,16,342], index: 0, kind: input, shape index: {}]   ;;  %s1631_s1 = inlined_call_operand.vmem [shape: bf16[16,144], index: 1, kind: input, shape index: {}]   ;;  %s1632_s2 = inlined_call_operand.vmem [shape: f32[16,1], index: 2, kind: input, shape index: {}]   ;;  %s1633_s3 = inlined_call_operand.vmem [shape: bf16[8,144], index: 3, kind: input, shape index: {}]   ;;  %s1634_s4 = inlined_call_operand.vmem [shape: f32[8,1], index: 4, kind: input, shape index: {}]   ;;  %s1635_s5 = inlined_call_operand.vmem [shape: bf16[8,16], index: 5, kind: input, shape index: {}]   ;;  %s1636_s6 = inlined_call_operand.vmem [shape: f32[8,1], index: 6, kind: input, shape index: {}]   ;;  %s1637_s7 = inlined_call_operand.vmem [shape: f32[2,8,288], index: 7, kind: output, shape index: {}]  }
   0x1 LB: > { %s1244_s25 = sadd.s32 4294967295, %s1348_s24   ;;  %p1248_p0 = scmp.ge.s32.totalorder %s1348_s24, 1  ;;  %s1348_s24 = sphi %s1402_s24, %s17_s24  }
   0x2   : > { %p237_p1 = scmp.lt.s32.totalorder %s1348_s24, 3 }
   0x4   : > { %p238_p2 = pnand %p1248_p0, %p237_p1 }
   0x5   : > { %p269_p3 = scmp.lt.s32.totalorder (!%p238_p2), %s1244_s25, 1  ;;  %v1350_v0 = vmov (!%p238_p2), 0   ;;  %s1351_s30 = smov (!%p238_p2), 127   ;;  %vm327_vm0 = vcmask (!%p238_p2), 261120   ;;  %v1338_v12 = vld [vmem:[%s1631_s1 + $0x4] ss:$8 sps:$4 sm:$0xff] (!%p238_p2)  }
   0x6   : > { %241 = sbr.rel (%p238_p2) target bundleno = 925 (0x39d), region = 48  ;;  %682 = vmatprep.subr.bf16.mxu1 (!%p238_p2), %v1350_v0  ;;  %1322 = vset.pattern.permute.xlu0 (!%p238_p2), %v1350_v0  ;;  %s1352_s8 = smov (!%p238_p2), 126   ;;  %vm635_vm1 = vcmask (!%p238_p2), 130048   ;;  %v614_v14 = vld [vmem:[%s1632_s2] sm:$0xff] (!%p238_p2)  ;;  %v615_v15 = vld [vmem:[%s1632_s2 + $0x8] sm:$0xff] (!%p238_p2)  ;;  %vm352_vm2 = vcmask (!%p238_p2), 1039360  }
   0x7   : > { %1323 = vset.pattern.permute.xlu1 (!%p238_p2), %v1350_v0  ;;  %s1353_s9 = smov (!%p238_p2), 110   ;;  %s1354_s10 = smov (!%p238_p2), 109   ;;  %1280 = vmatprep.mubr.msk.bf16.mxu0 (!%p238_p2), %vm635_vm1, %v1338_v12  ;;  %vm384_vm3 = vcmask (!%p238_p2), 1031168   ;;  %vm416_vm4 = vcmask (!%p238_p2), 900096   ;;  %vm448_vm5 = vcmask (!%p238_p2), 891904   ;;  %vm480_vm6 = vcmask (!%p238_p2), 883712  }
   0x8   : > { %s1355_s11 = smov (!%p238_p2), 108   ;;  %s1356_s12 = smov (!%p238_p2), 92   ;;  %1281 = vmatprep.mubr.msk.bf16.mxu1 (!%p238_p2), %vm635_vm1, %v1338_v12  ;;  %vm512_vm7 = vcmask (!%p238_p2), 752640   ;;  %vm544_vm8 = vcmask (!%p238_p2), 744448   ;;  %vm576_vm9 = vcmask (!%p238_p2), 736256   ;;  %vm741_vm10 = vcmask (!%p238_p2), 154624  }
   0x9   : > { %s1357_s15 = smov (!%p238_p2), 91   ;;  %s1358_s16 = smov (!%p238_p2), 90   ;;  %v1336_v63 = vld [vmem:[%s1631_s1] ss:$8 sps:$4 sm:$0xff] (!%p238_p2)   ;;  %742 = vst.msk [vmem:[#allocation2] sm:$0xff] (!%p238_p2), %vm741_vm10, %v1350_v0  ;;  %vm743_vm11 = vcmask (!%p238_p2), 703896  }
   0xa   : > { %744 = vst.msk [vmem:[#allocation2 + $0x10] sm:$0xff] (!%p238_p2), %vm743_vm11, %v1350_v0  ;;  %s1359_s23 = smov (!%p238_p2), 19   ;;  %vm763_vm15 = vcmask (!%p238_p2), 1047704   ;;  %vm766_vm11 = vcmask (!%p238_p2), 416768  }
   0xd   : > { %s1639_s25 = smov (!%p269_p3, %s1244_s25), 1 }
   0xe   : > { %s1301_s26 = smul.u32 24, %s1639_s25 }
  0x10   : > { %s1421_s29 = scalar_lea.vmem %s1630_s0, %s1301_s26  ;;  %s278_s14 = scalar_lea.vmem %s1637_s7, %s1301_s26 }
  0x11   : > { %v1424_v1 = vld [vmem:[%s1421_s29 + $0x4] ss:$12 sps:$4 sm:$0xff]   ;;  %v1427_v2 = vld [vmem:[%s1421_s29] ss:$12 sps:$4 sm:$0xff]   ;;  %v1327_v3 = vld [vmem:[%s1421_s29 + $0x8] ss:$12 sps:$4 sm:$0xff]  }
  0x12   : > { %348 = vrot.lane.b32.xlu0 %v1424_v1, %s1351_s30  ;;  %639 = vmatprep.subr.bf16.mxu0 %v1424_v1  ;;  %v1328_v4 = vld [vmem:[%s1421_s29 + $0x8] ss:$12 sps:$4 sm:$0xff]  }
  0x13   : > { %346 = vrot.lane.b32.xlu1 %v1427_v2, %s1351_s30  ;;  %640 = vmatpush1.bf16.msra.mxu0 %v1427_v2  ;;  %v1335_v5 = vld [vmem:[%s1421_s29 + $0x8] ss:$12 sps:$4 sm:$0xff]  }
  0x14   : > { %v1329_v6 = vld [vmem:[%s1421_s29 + $0x8] ss:$12 sps:$4 sm:$0xff]   ;;  %328 = vst.msk [vmem:[#allocation3 + $0x10] sm:$0xff] %vm327_vm0, %v1335_v5 }
  0x15   : > { %v1330_v7 = vld [vmem:[%s1421_s29 + $0x8] ss:$12 sps:$4 sm:$0xff]  }
  0x16   : > { %350 = vrot.lane.b32.xlu0 %v1327_v3, %s1351_s30  ;;  %v1331_v9 = vld [vmem:[%s1421_s29 + $0x8] ss:$12 sps:$4 sm:$0xff]  }
  0x17   : > { %380 = vrot.lane.b32.xlu1 %v1424_v1, %s1352_s8  ;;  %v1332_v10 = vld [vmem:[%s1421_s29 + $0x8] ss:$12 sps:$4 sm:$0xff]  }
  0x18   : > { %v1333_v11 = vld [vmem:[%s1421_s29 + $0x8] ss:$12 sps:$4 sm:$0xff]  }
  0x19   : > { %v1334_v13 = vld [vmem:[%s1421_s29 + $0x8] ss:$12 sps:$4 sm:$0xff]  }
  0x1a   : > { %382 = vrot.lane.b32.xlu0 %v1328_v4, %s1352_s8  ;;  %v280_v4 = vlaneseq }
  0x1b   : > { %378 = vrot.lane.b32.xlu1 %v1427_v2, %s1352_s8  ;;  %v589_v8 = vld [vmem:[#allocation3 + $0x10] sm:$0xff] }
  0x1c   : > { %683 = vmatpush1.bf16.msra.mxu1 %v589_v8  ;;  %v281_v5 = vand.u32 127, %v280_v4  ;;  %v1556_v4 = vld [vmem:[%s1633_s3] sm:$0xff] }
  0x1d   : > { %684 = vmatprep.subr.bf16.mxu1 %v1350_v0 }
  0x1e   : > { %412 = vrot.lane.b32.xlu0 %v1424_v1, %s1353_s9 }
  0x1f   : > { %414 = vrot.lane.b32.xlu1 %v1329_v6, %s1353_s9  ;;  %v282_v6 = vadd.s32 128, %v281_v5 }
  0x21   : > { %v285_v8 = vcvt.s32.f32 %v282_v6  ;;  %v1339_v6 = vld [vmem:[%s1421_s29 + $0x8] ss:$12 sps:$4 sm:$0xff]  }
  0x22   : > { %410 = vrot.lane.b32.xlu0 %v1427_v2, %s1353_s9 }
  0x23   : > { %444 = vrot.lane.b32.xlu1 %v1424_v1, %s1354_s10 }
  0x26   : > { %446 = vrot.lane.b32.xlu0 %v1330_v7, %s1354_s10  ;;  %v284_v7 = vcvt.s32.f32 %v281_v5 }
  0x27   : > { %442 = vrot.lane.b32.xlu1 %v1427_v2, %s1354_s10 }
  0x2a   : > { %476 = vrot.lane.b32.xlu0 %v1424_v1, %s1355_s11 }
  0x2b   : > { %478 = vrot.lane.b32.xlu1 %v1331_v9, %s1355_s11  ;;  %v283_v9 = vadd.s32 256, %v281_v5  ;;  %v1283_v5 = vcombine.high %v1556_v4, %v1556_v4 }
  0x2d   : > { %v286_v12 = vcvt.s32.f32 %v283_v9 }
  0x2e   : > { %474 = vrot.lane.b32.xlu0 %v1427_v2, %s1355_s11 }
  0x2f   : > { %508 = vrot.lane.b32.xlu1 %v1424_v1, %s1356_s12 }
  0x32   : > { %510 = vrot.lane.b32.xlu0 %v1332_v10, %s1356_s12  ;;  %v287_v10 = vadd.f32 0.5, %v284_v7 }
  0x33   : > { %506 = vrot.lane.b32.xlu1 %v1427_v2, %s1356_s12 }
  0x36   : > { %540 = vrot.lane.b32.xlu0 %v1424_v1, %s1357_s15 }
  0x37   : > { %542 = vrot.lane.b32.xlu1 %v1333_v11, %s1357_s15  ;;  %v288_v11 = vadd.f32 0.5, %v285_v8 }
  0x3a   : > { %538 = vrot.lane.b32.xlu0 %v1427_v2, %s1357_s15 }
  0x3b   : > { %572 = vrot.lane.b32.xlu1 %v1424_v1, %s1358_s16 }
  0x3e   : > { %574 = vrot.lane.b32.xlu0 %v1334_v13, %s1358_s16  ;;  %v290_v13 = vmul.f32 0.055555556, %v287_v10 }
  0x3f   : > { %570 = vrot.lane.b32.xlu1 %v1427_v2, %s1358_s16 }
  0x42   : > { %618 = vperm.xlu0 %1322, %v614_v14   ;;  %v291_v14 = vmul.f32 0.055555556, %v288_v11 }
  0x43   : > { %623 = vperm.xlu1 %1323, %v615_v15   ;;  %v289_v15 = vadd.f32 0.5, %v286_v12 }
  0x84   : > { %v349_v16 = vpop.permute.xlu0 %348 }
  0x85   : > { %v347_v17 = vpop.permute.xlu1 %346 }
  0x86   : > { %v353_v21 = vsel %vm352_vm2, %v347_v17, %v349_v16  ;;  %v294_v17 = vfloor.f32 %v291_v14 }
  0x88   : > { %v351_v18 = vpop.permute.xlu0 %350 }
  0x89   : > { %v354_v19 = vsel %vm352_vm2, %v349_v16, %v351_v18  ;;  %360 = vst.msk [vmem:[#allocation3 + $0x28] sm:$0xff] %vm327_vm0, %v351_v18  ;;  %v381_v20 = vpop.permute.xlu1 %380  ;;  %v293_v16 = vfloor.f32 %v290_v13  ;;  %v292_v18 = vmul.f32 0.055555556, %v289_v15 }
  0x8a   : > { %641 = vmatprep.subr.bf16.mxu0 %v354_v19 }
  0x8b   : > { %642 = vmatpush1.bf16.msra.mxu0 %v353_v21  ;;  %v296_v19 = vmul.f32 18.0, %v293_v16 }
  0x8c   : > { %v383_v22 = vpop.permute.xlu0 %382 }
  0x8d   : > { %v386_v23 = vsel %vm384_vm3, %v381_v20, %v383_v22  ;;  %392 = vst.msk [vmem:[#allocation3 + $0x40] sm:$0xff] %vm327_vm0, %v383_v22  ;;  %v379_v24 = vpop.permute.xlu1 %378  ;;  %v295_v22 = vfloor.f32 %v292_v18 }
  0x8e   : > { %v385_v25 = vsel %vm384_vm3, %v379_v24, %v381_v20  ;;  %643 = vmatprep.subr.bf16.mxu0 %v386_v23  ;;  %v297_v20 = vmul.f32 18.0, %v294_v17  ;;  %v299_v23 = vsub.f32 %v284_v7, %v296_v19  ;;  %v1063_v7 = vld [vmem:[%s1636_s6] sm:$0xff] }
  0x8f   : > { %644 = vmatpush1.bf16.msra.mxu0 %v385_v25 }
  0x90   : > { %v413_v26 = vpop.permute.xlu0 %412  ;;  %v592_v27 = vld [vmem:[#allocation3 + $0x28] sm:$0xff]  ;;  %vm302_vm12 = vcmp.lt.f32.partialorder %v299_v23, 15.5 }
  0x91   : > { %v415_v28 = vpop.permute.xlu1 %414  ;;  %685 = vmatpush1.bf16.msra.mxu1 %v592_v27  ;;  %v300_v27 = vsub.f32 %v285_v8, %v297_v20  ;;  %v962_v8 = vld [vmem:[%s1634_s4] sm:$0xff] }
  0x92   : > { %v418_v29 = vsel %vm416_vm4, %v413_v26, %v415_v28  ;;  %424 = vst.msk [vmem:[#allocation3 + $0x58] sm:$0xff] %vm327_vm0, %v415_v28  ;;  %686 = vmatprep.subr.bf16.mxu1 %v1350_v0 }
  0x93   : > { %645 = vmatprep.subr.bf16.mxu0 %v418_v29  ;;  %v298_v29 = vmul.f32 18.0, %v295_v22  ;;  %vm303_vm13 = vcmp.lt.f32.partialorder %v300_v27, 15.5 }
  0x94   : > { %v411_v30 = vpop.permute.xlu0 %410  ;;  %v595_v31 = vld [vmem:[#allocation3 + $0x40] sm:$0xff] }
  0x95   : > { %v417_v32 = vsel %vm416_vm4, %v411_v30, %v413_v26  ;;  %v445_v33 = vpop.permute.xlu1 %444  ;;  %687 = vmatpush1.bf16.msra.mxu1 %v595_v31 }
  0x96   : > { %688 = vmatprep.subr.bf16.mxu1 %v1350_v0  ;;  %646 = vmatpush1.bf16.msra.mxu0 %v417_v32 }
  0x98   : > { %v447_v34 = vpop.permute.xlu0 %446 }
  0x99   : > { %v450_v35 = vsel %vm448_vm5, %v445_v33, %v447_v34  ;;  %456 = vst.msk [vmem:[#allocation3 + $0x70] sm:$0xff] %vm327_vm0, %v447_v34  ;;  %v443_v36 = vpop.permute.xlu1 %442  ;;  %v598_v37 = vld [vmem:[#allocation3 + $0x58] sm:$0xff] }
  0x9a   : > { %v449_v38 = vsel %vm448_vm5, %v443_v36, %v445_v33  ;;  %689 = vmatpush1.bf16.msra.mxu1 %v598_v37  ;;  %647 = vmatprep.subr.bf16.mxu0 %v450_v35 }
  0x9b   : > { %690 = vmatprep.subr.bf16.mxu1 %v1350_v0  ;;  %648 = vmatpush1.bf16.msra.mxu0 %v449_v38  ;;  %v301_v38 = vsub.f32 %v286_v12, %v298_v29 }
  0x9c   : > { %v477_v39 = vpop.permute.xlu0 %476 }
  0x9d   : > { %v479_v40 = vpop.permute.xlu1 %478  ;;  %vm304_vm14 = vcmp.lt.f32.partialorder %v301_v38, 15.5 }
  0x9e   : > { %v482_v41 = vsel %vm480_vm6, %v477_v39, %v479_v40  ;;  %488 = vst.msk [vmem:[#allocation3 + $0x88] sm:$0xff] %vm327_vm0, %v479_v40 }
  0x9f   : > { %649 = vmatprep.subr.bf16.mxu0 %v482_v41 }
  0xa0   : > { %v475_v42 = vpop.permute.xlu0 %474  ;;  %v601_v43 = vld [vmem:[#allocation3 + $0x70] sm:$0xff] }
  0xa1   : > { %v481_v44 = vsel %vm480_vm6, %v475_v42, %v477_v39  ;;  %v509_v45 = vpop.permute.xlu1 %508  ;;  %691 = vmatpush1.bf16.msra.mxu1 %v601_v43 }
  0xa2   : > { %692 = vmatprep.subr.bf16.mxu1 %v1350_v0  ;;  %650 = vmatpush1.bf16.msra.mxu0 %v481_v44 }
  0xa4   : > { %v511_v46 = vpop.permute.xlu0 %510 }
  0xa5   : > { %v514_v47 = vsel %vm512_vm7, %v509_v45, %v511_v46  ;;  %520 = vst.msk [vmem:[#allocation3 + $0xa0] sm:$0xff] %vm327_vm0, %v511_v46  ;;  %v507_v48 = vpop.permute.xlu1 %506  ;;  %v604_v49 = vld [vmem:[#allocation3 + $0x88] sm:$0xff] }
  0xa6   : > { %v513_v50 = vsel %vm512_vm7, %v507_v48, %v509_v45  ;;  %693 = vmatpush1.bf16.msra.mxu1 %v604_v49  ;;  %651 = vmatprep.subr.bf16.mxu0 %v514_v47 }
  0xa7   : > { %694 = vmatprep.subr.bf16.mxu1 %v1350_v0  ;;  %652 = vmatpush1.bf16.msra.mxu0 %v513_v50 }
  0xa8   : > { %v541_v51 = vpop.permute.xlu0 %540 }
  0xa9   : > { %v543_v52 = vpop.permute.xlu1 %542 }
  0xaa   : > { %v546_v53 = vsel %vm544_vm8, %v541_v51, %v543_v52  ;;  %552 = vst.msk [vmem:[#allocation3 + $0xb8] sm:$0xff] %vm327_vm0, %v543_v52 }
  0xab   : > { %653 = vmatprep.subr.bf16.mxu0 %v546_v53 }
  0xac   : > { %v539_v54 = vpop.permute.xlu0 %538  ;;  %v607_v55 = vld [vmem:[#allocation3 + $0xa0] sm:$0xff] }
  0xad   : > { %v545_v56 = vsel %vm544_vm8, %v539_v54, %v541_v51  ;;  %v573_v57 = vpop.permute.xlu1 %572  ;;  %695 = vmatpush1.bf16.msra.mxu1 %v607_v55 }
  0xae   : > { %696 = vmatprep.subr.bf16.mxu1 %v1350_v0  ;;  %654 = vmatpush1.bf16.msra.mxu0 %v545_v56 }
  0xb0   : > { %v575_v58 = vpop.permute.xlu0 %574 }
  0xb1   : > { %v578_v59 = vsel %vm576_vm9, %v573_v57, %v575_v58  ;;  %584 = vst.msk [vmem:[#allocation3 + $0xd0] sm:$0xff] %vm327_vm0, %v575_v58  ;;  %v571_v60 = vpop.permute.xlu1 %570  ;;  %v610_v61 = vld [vmem:[#allocation3 + $0xb8] sm:$0xff] }
  0xb2   : > { %v577_v62 = vsel %vm576_vm9, %v571_v60, %v573_v57  ;;  %697 = vmatpush1.bf16.msra.mxu1 %v610_v61  ;;  %655 = vmatprep.subr.bf16.mxu0 %v578_v59 }
  0xb3   : > { %698 = vmatprep.subr.bf16.mxu1 %v1350_v0  ;;  %656 = vmatpush1.bf16.msra.mxu0 %v577_v62 }
  0xb6   : > { %672 = vmatmul.mubr.bf16.vlgmr.msra.gmra.mrb[0].mxu0 %v1336_v63 }
  0xb7   : > { %1284 = vmatprep.mubr.msk.bf16.mxu0 %vm635_vm1, %v1283_v5 }
  0xb8   : > { %v613_v3 = vld [vmem:[#allocation3 + $0xd0] sm:$0xff] }
  0xb9   : > { %699 = vmatpush1.bf16.msra.mxu1 %v613_v3 }
  0xba   : > { %1018 = vmatprep.subr.bf16.mxu1 %v1350_v0 }
  0xbc   : > { %715 = vmatmul.mubr.bf16.vlgmr.msra.gmra.mrb[0].mxu1 %v1336_v63 }
  0xbd   : > { %1285 = vmatprep.mubr.msk.bf16.mxu1 %vm635_vm1, %v1283_v5 }
  0xc1   : > { %v619_v21 = vpop.permute.xlu0 %618 }
  0xc2   : > { %v624_v25 = vpop.permute.xlu1 %623 }
 0x189   : > { %v673_v24 = vpop.f32.mrb[0].mxu0 }
 0x18a   : > { %v674_v26 = vadd.f32 %v673_v24, %v619_v21  ;;  %v675_v28 = vpop.f32.mrb[1].mxu0 }
 0x18b   : > { %v676_v30 = vadd.f32 %v675_v28, %v619_v21  ;;  %v677_v31 = vpop.f32.mrb[2].mxu0 }
 0x18c   : > { %v723_v32 = vmax.f32 %v674_v26, 0.0  ;;  %v678_v33 = vadd.f32 %v677_v31, %v624_v25  ;;  %v679_v34 = vpop.f32.mrb[3].mxu0 }
 0x18d   : > { %v724_v35 = vmax.f32 %v676_v30, 0.0  ;;  %v680_v36 = vadd.f32 %v679_v34, %v624_v25 }
 0x18e   : > { %v726_v37 = vmax.f32 %v678_v33, 0.0  ;;  %v735_v41 = vsel %vm302_vm12, %v723_v32, 0.0 }
 0x18f   : > { %v716_v39 = vpop.f32.mrb[0].mxu1  ;;  %v727_v40 = vmax.f32 %v680_v36, 0.0  ;;  %v736_v45 = vsel %vm303_vm13, %v724_v35, 0.0 }
 0x190   : > { %v717_v42 = vadd.f32 %v716_v39, %v619_v21  ;;  %v718_v43 = vpop.f32.mrb[1].mxu1  ;;  %v738_v44 = vsel %vm302_vm12, %v726_v37, 0.0 }
 0x191   : > { %v719_v46 = vpop.f32.mrb[2].mxu1  ;;  %v739_v47 = vsel %vm303_vm13, %v727_v40, 0.0  ;;  %v745_v48 = vpack.c.bf16 %v738_v44, %v735_v41 }
 0x192   : > { %v725_v49 = vmax.f32 %v717_v42, 0.0  ;;  %v720_v50 = vadd.f32 %v719_v46, %v624_v25  ;;  %v746_v51 = vpack.c.bf16 %v739_v47, %v736_v45  ;;  %v721_v52 = vpop.f32.mrb[3].mxu1 }
 0x193   : > { %751 = vrot.lane.b32.xlu1 %v745_v48, %s1359_s23 }
 0x194   : > { %v728_v53 = vmax.f32 %v720_v50, 0.0  ;;  %753 = vrot.lane.b32.xlu0 %v746_v51, %s1359_s23  ;;  %v737_v54 = vsel %vm304_vm14, %v725_v49, 0.0 }
 0x196   : > { %v740_v55 = vsel %vm304_vm14, %v728_v53, 0.0  ;;  %v1282_v53 = vcombine.low %v1556_v4, %v1556_v4 }
 0x197   : > { %v747_v56 = vpack.c.bf16 %v740_v55, %v737_v54 }
 0x199   : > { %755 = vrot.lane.b32.xlu1 %v747_v56, %s1359_s23 }
 0x205   : > { %v752_v57 = vpop.permute.xlu1 %751 }
 0x206   : > { %764 = vst.msk [vmem:[#allocation2] sm:$0xff] %vm763_vm15, %v752_v57  ;;  %v754_v58 = vpop.permute.xlu0 %753 }
 0x207   : > { %v758_v59 = vsel %vm741_vm10, %v752_v57, %v754_v58 }
 0x208   : > { %977 = vmatprep.subr.bf16.mxu0 %v758_v59 }
 0x20b   : > { %v756_v60 = vpop.permute.xlu1 %755 }
 0x20c   : > { %v759_v61 = vsel %vm741_vm10, %v754_v58, %v756_v60 }
 0x20d   : > { %v768_v62 = vld [vmem:[#allocation2] sm:$0xff]  ;;  %767 = vst.msk [vmem:[#allocation2 + $0x10] sm:$0xff] %vm766_vm11, %v759_v61  ;;  %v1360_v61 = vmov 0.0  }
 0x20e   : > { %800 = vrot.lane.b32.xlu1 %v768_v62, %s1352_s8  ;;  %780 = vrot.lane.b32.xlu0 %v768_v62, %s1351_s30 }
 0x20f   : > { %978 = vmatpush1.bf16.msra.mxu0 %v768_v62 }
 0x212   : > { %840 = vrot.lane.b32.xlu1 %v768_v62, %s1354_s10  ;;  %820 = vrot.lane.b32.xlu0 %v768_v62, %s1353_s9 }
 0x214   : > { %v770_v63 = vld [vmem:[#allocation2 + $0x10] sm:$0xff] }
 0x215   : > { %773 = vst.msk [vmem:[#allocation3 + $0x10] sm:$0xff] %vm327_vm0, %v770_v63 }
 0x216   : > { %880 = vrot.lane.b32.xlu1 %v768_v62, %s1356_s12  ;;  %860 = vrot.lane.b32.xlu0 %v768_v62, %s1355_s11 }
 0x21a   : > { %900 = vrot.lane.b32.xlu0 %v768_v62, %s1357_s15  ;;  %784 = vrot.lane.b32.xlu1 %v770_v63, %s1351_s30 }
 0x21c   : > { %v937_v3 = vld [vmem:[#allocation3 + $0x10] sm:$0xff] }
 0x21d   : > { %1019 = vmatpush1.bf16.msra.mxu1 %v937_v3 }
 0x21e   : > { %782 = vrot.lane.b32.xlu0 %v758_v59, %s1351_s30  ;;  %802 = vrot.lane.b32.xlu1 %v758_v59, %s1352_s8 }
 0x21f   : > { %1020 = vmatprep.subr.bf16.mxu1 %v1350_v0 }
 0x222   : > { %804 = vrot.lane.b32.xlu0 %v770_v63, %s1352_s8  ;;  %824 = vrot.lane.b32.xlu1 %v770_v63, %s1353_s9 }
 0x226   : > { %822 = vrot.lane.b32.xlu0 %v758_v59, %s1353_s9  ;;  %842 = vrot.lane.b32.xlu1 %v758_v59, %s1354_s10 }
 0x22a   : > { %844 = vrot.lane.b32.xlu0 %v770_v63, %s1354_s10  ;;  %864 = vrot.lane.b32.xlu1 %v770_v63, %s1355_s11 }
 0x22e   : > { %862 = vrot.lane.b32.xlu0 %v758_v59, %s1355_s11  ;;  %882 = vrot.lane.b32.xlu1 %v758_v59, %s1356_s12 }
 0x232   : > { %884 = vrot.lane.b32.xlu0 %v770_v63, %s1356_s12  ;;  %904 = vrot.lane.b32.xlu1 %v770_v63, %s1357_s15 }
 0x236   : > { %902 = vrot.lane.b32.xlu0 %v758_v59, %s1357_s15  ;;  %922 = vrot.lane.b32.xlu1 %v758_v59, %s1358_s16 }
 0x23a   : > { %924 = vrot.lane.b32.xlu0 %v770_v63, %s1358_s16  ;;  %920 = vrot.lane.b32.xlu1 %v768_v62, %s1358_s16  ;;  %v1058_v62 = vld [vmem:[%s1635_s5] sm:$0xf] }
 0x23e   : > { %1084 = vrot.lane.b32.xlu0 %v1424_v1, %s1354_s10  ;;  %1086 = vrot.lane.b32.xlu1 %v1339_v6, %s1354_s10 }
 0x242   : > { %1082 = vrot.lane.b32.xlu0 %v1427_v2, %s1354_s10  ;;  %1066 = vperm.xlu1 %1323, %v1063_v7  }
 0x246   : > { %965 = vperm.xlu0 %1322, %v962_v8  }
 0x280   : > { %v781_v9 = vpop.permute.xlu0 %780  ;;  %v801_v10 = vpop.permute.xlu1 %800 }
 0x284   : > { %v821_v11 = vpop.permute.xlu0 %820  ;;  %v841_v12 = vpop.permute.xlu1 %840 }
 0x288   : > { %v861_v1 = vpop.permute.xlu0 %860  ;;  %v881_v13 = vpop.permute.xlu1 %880 }
 0x28c   : > { %v901_v14 = vpop.permute.xlu0 %900  ;;  %v785_v15 = vpop.permute.xlu1 %784 }
 0x28d   : > { %793 = vst.msk [vmem:[#allocation3 + $0x28] sm:$0xff] %vm327_vm0, %v785_v15 }
 0x290   : > { %v783_v16 = vpop.permute.xlu0 %782  ;;  %v803_v17 = vpop.permute.xlu1 %802 }
 0x291   : > { %v786_v2 = vsel %vm352_vm2, %v781_v9, %v783_v16  ;;  %v787_v18 = vsel %vm352_vm2, %v783_v16, %v785_v15  ;;  %v806_v19 = vsel %vm384_vm3, %v801_v10, %v803_v17  ;;  %vm1361_vm2 = vmmov 0  }
 0x292   : > { %979 = vmatprep.subr.bf16.mxu0 %v787_v18 }
 0x293   : > { %980 = vmatpush1.bf16.msra.mxu0 %v786_v2 }
 0x294   : > { %v805_v20 = vpop.permute.xlu0 %804  ;;  %v825_v21 = vpop.permute.xlu1 %824  ;;  %v940_v22 = vld [vmem:[#allocation3 + $0x28] sm:$0xff] }
 0x295   : > { %v807_v23 = vsel %vm384_vm3, %v803_v17, %v805_v20  ;;  %813 = vst.msk [vmem:[#allocation3 + $0x40] sm:$0xff] %vm327_vm0, %v805_v20  ;;  %833 = vst.msk [vmem:[#allocation3 + $0x58] sm:$0xff] %vm327_vm0, %v825_v21  ;;  %1021 = vmatpush1.bf16.msra.mxu1 %v940_v22 }
 0x296   : > { %1022 = vmatprep.subr.bf16.mxu1 %v1350_v0  ;;  %981 = vmatprep.subr.bf16.mxu0 %v807_v23 }
 0x297   : > { %982 = vmatpush1.bf16.msra.mxu0 %v806_v19 }
 0x298   : > { %v823_v24 = vpop.permute.xlu0 %822  ;;  %v843_v25 = vpop.permute.xlu1 %842 }
 0x299   : > { %v826_v26 = vsel %vm416_vm4, %v821_v11, %v823_v24  ;;  %v827_v27 = vsel %vm416_vm4, %v823_v24, %v825_v21  ;;  %v846_v28 = vsel %vm448_vm5, %v841_v12, %v843_v25 }
 0x29a   : > { %983 = vmatprep.subr.bf16.mxu0 %v827_v27 }
 0x29b   : > { %984 = vmatpush1.bf16.msra.mxu0 %v826_v26 }
 0x29c   : > { %v845_v29 = vpop.permute.xlu0 %844  ;;  %v865_v30 = vpop.permute.xlu1 %864  ;;  %v943_v31 = vld [vmem:[#allocation3 + $0x40] sm:$0xff]  ;;  %v946_v35 = vld [vmem:[#allocation3 + $0x58] sm:$0xff] }
 0x29d   : > { %v847_v32 = vsel %vm448_vm5, %v843_v25, %v845_v29  ;;  %853 = vst.msk [vmem:[#allocation3 + $0x70] sm:$0xff] %vm327_vm0, %v845_v29  ;;  %873 = vst.msk [vmem:[#allocation3 + $0x88] sm:$0xff] %vm327_vm0, %v865_v30  ;;  %1023 = vmatpush1.bf16.msra.mxu1 %v943_v31 }
 0x29e   : > { %1024 = vmatprep.subr.bf16.mxu1 %v1350_v0  ;;  %985 = vmatprep.subr.bf16.mxu0 %v847_v32 }
 0x29f   : > { %986 = vmatpush1.bf16.msra.mxu0 %v846_v28 }
 0x2a0   : > { %v863_v33 = vpop.permute.xlu0 %862  ;;  %v883_v34 = vpop.permute.xlu1 %882 }
 0x2a1   : > { %v866_v36 = vsel %vm480_vm6, %v861_v1, %v863_v33  ;;  %v867_v37 = vsel %vm480_vm6, %v863_v33, %v865_v30  ;;  %v886_v38 = vsel %vm512_vm7, %v881_v13, %v883_v34  ;;  %1025 = vmatpush1.bf16.msra.mxu1 %v946_v35 }
 0x2a2   : > { %1026 = vmatprep.subr.bf16.mxu1 %v1350_v0  ;;  %987 = vmatprep.subr.bf16.mxu0 %v867_v37 }
 0x2a3   : > { %988 = vmatpush1.bf16.msra.mxu0 %v866_v36 }
 0x2a4   : > { %v885_v39 = vpop.permute.xlu0 %884  ;;  %v905_v40 = vpop.permute.xlu1 %904  ;;  %v949_v41 = vld [vmem:[#allocation3 + $0x70] sm:$0xff]  ;;  %v952_v45 = vld [vmem:[#allocation3 + $0x88] sm:$0xff] }
 0x2a5   : > { %v887_v42 = vsel %vm512_vm7, %v883_v34, %v885_v39  ;;  %893 = vst.msk [vmem:[#allocation3 + $0xa0] sm:$0xff] %vm327_vm0, %v885_v39  ;;  %913 = vst.msk [vmem:[#allocation3 + $0xb8] sm:$0xff] %vm327_vm0, %v905_v40  ;;  %1027 = vmatpush1.bf16.msra.mxu1 %v949_v41 }
 0x2a6   : > { %1028 = vmatprep.subr.bf16.mxu1 %v1350_v0  ;;  %989 = vmatprep.subr.bf16.mxu0 %v887_v42 }
 0x2a7   : > { %990 = vmatpush1.bf16.msra.mxu0 %v886_v38 }
 0x2a8   : > { %v903_v43 = vpop.permute.xlu0 %902  ;;  %v923_v44 = vpop.permute.xlu1 %922 }
 0x2a9   : > { %v906_v46 = vsel %vm544_vm8, %v901_v14, %v903_v43  ;;  %v907_v47 = vsel %vm544_vm8, %v903_v43, %v905_v40  ;;  %1029 = vmatpush1.bf16.msra.mxu1 %v952_v45 }
 0x2aa   : > { %1030 = vmatprep.subr.bf16.mxu1 %v1350_v0  ;;  %991 = vmatprep.subr.bf16.mxu0 %v907_v47 }
 0x2ab   : > { %992 = vmatpush1.bf16.msra.mxu0 %v906_v46 }
 0x2ac   : > { %v925_v48 = vpop.permute.xlu0 %924  ;;  %v921_v49 = vpop.permute.xlu1 %920  ;;  %v955_v50 = vld [vmem:[#allocation3 + $0xa0] sm:$0xff]  ;;  %v958_v55 = vld [vmem:[#allocation3 + $0xb8] sm:$0xff] }
 0x2ad   : > { %v927_v51 = vsel %vm576_vm9, %v923_v44, %v925_v48  ;;  %933 = vst.msk [vmem:[#allocation3 + $0xd0] sm:$0xff] %vm327_vm0, %v925_v48  ;;  %v926_v52 = vsel %vm576_vm9, %v921_v49, %v923_v44  ;;  %1031 = vmatpush1.bf16.msra.mxu1 %v955_v50 }
 0x2ae   : > { %1032 = vmatprep.subr.bf16.mxu1 %v1350_v0  ;;  %993 = vmatprep.subr.bf16.mxu0 %v927_v51 }
 0x2af   : > { %994 = vmatpush1.bf16.msra.mxu0 %v926_v52 }
 0x2b0   : > { %v1085_v54 = vpop.permute.xlu0 %1084  ;;  %v1087_v56 = vpop.permute.xlu1 %1086 }
 0x2b1   : > { %1033 = vmatpush1.bf16.msra.mxu1 %v958_v55  ;;  %v1089_v57 = vsel %vm448_vm5, %v1085_v54, %v1087_v56 }
 0x2b2   : > { %1034 = vmatprep.subr.bf16.mxu1 %v1350_v0  ;;  %1096 = vmatprep.subr.bf16.mxu0 %v1089_v57 }
 0x2b3   : > { %1010 = vmatmul.mubr.bf16.vlgmr.msra.gmra.mrb[4].mxu0 %v1282_v53 }
 0x2b4   : > { %v1083_v58 = vpop.permute.xlu0 %1082  ;;  %v961_v59 = vld [vmem:[#allocation3 + $0xd0] sm:$0xff]  ;;  %1128 = vmatprep.mubr.bf16.mxu0 %v1350_v0 }
 0x2b5   : > { %v1088_v60 = vsel %vm448_vm5, %v1083_v58, %v1085_v54  ;;  %1035 = vmatpush1.bf16.msra.mxu1 %v961_v59 }
 0x2b6   : > { %1295 = vmatprep.subr.bf16.mxu1 %v1360_v61  ;;  %1097 = vmatpush1.bf16.msra.mxu0 %v1088_v60 }
 0x2b8   : > { %1051 = vmatmul.mubr.bf16.vlgmr.msra.gmra.mrb[4].mxu1 %v1282_v53 }
 0x2b9   : > { %1296 = vmatpush3.bf16.msra.mxu1 %v1087_v56  ;;  %1297 = vmatprep.mubr.msk.bf16.mxu1 %vm1361_vm2, %v1360_v61 }
 0x2bb   : > { %1289 = vmatmul.mubr.msk.bf16.vlgmr.msra.gmra.mrb[8].mxu0 %vm635_vm1, %v1058_v62 }
 0x2c0   : > { %1298 = vmatmul.mubr.msk.bf16.vlgmr.msra.gmra.mrb[8].mxu1 %vm635_vm1, %v1058_v62 }
 0x2c1   : > { %v1067_v7 = vpop.permute.xlu1 %1066 }
 0x2c5   : > { %v966_v1 = vpop.permute.xlu0 %965 }
 0x386   : > { %v1011_v63 = vpop.f32.mrb[4].mxu0 }
 0x387   : > { %v1013_v0 = vpop.f32.mrb[5].mxu0  ;;  %v1012_v15 = vadd.f32 %v1011_v63, %v966_v1 }
 0x388   : > { %v1015_v3 = vpop.f32.mrb[6].mxu0  ;;  %v1014_v2 = vadd.f32 %v1013_v0, %v966_v1 }
 0x389   : > { %v1016_v4 = vpop.f32.mrb[7].mxu0 }
 0x38b   : > { %v1052_v5 = vpop.f32.mrb[4].mxu1 }
 0x38c   : > { %v1054_v6 = vpop.f32.mrb[5].mxu1  ;;  %v1053_v26 = vadd.f32 %v1052_v5, %v966_v1 }
 0x38d   : > { %v1055_v8 = vpop.f32.mrb[6].mxu1 }
 0x38e   : > { %v1056_v9 = vpop.f32.mrb[7].mxu1  ;;  %v1130_v10 = vpop.f32.mrb[8].mxu0 }
 0x38f   : > { %v1131_v11 = vadd.f32 %v1130_v10, %v1067_v7  ;;  %v1132_v12 = vpop.f32.mrb[9].mxu0 }
 0x390   : > { %v1133_v13 = vadd.f32 %v1132_v12, %v1067_v7  ;;  %v1134_v14 = vpop.f32.mrb[10].mxu0 }
 0x391   : > { %v1177_v16 = vmul.f32 0.8, %v1131_v11  ;;  %v1135_v17 = vpop.f32.mrb[11].mxu0 }
 0x392   : > { %v1178_v18 = vmul.f32 0.8, %v1133_v13 }
 0x393   : > { %v1171_v19 = vpop.f32.mrb[8].mxu1  ;;  %v1180_v20 = vadd.f32 %v1177_v16, %v1012_v15 }
 0x394   : > { %v1172_v21 = vadd.f32 %v1171_v19, %v1067_v7  ;;  %v1299_v22 = vpop.f32.mrb[9].mxu1  ;;  %v1181_v23 = vadd.f32 %v1178_v18, %v1014_v2 }
 0x395   : > { %v1183_v24 = vmax.f32 %v1180_v20, 0.0  ;;  %v1174_v25 = vpop.f32.mrb[10].mxu1 }
 0x396   : > { %v1179_v27 = vmul.f32 0.8, %v1172_v21  ;;  %v1184_v28 = vmax.f32 %v1181_v23, 0.0  ;;  %v1300_v29 = vpop.f32.mrb[11].mxu1 }
 0x397   : > { %1186 = vst [vmem:[%s278_s14] sm:$0xff] %v1183_v24 }
 0x398   : > { %v1182_v30 = vadd.f32 %v1179_v27, %v1053_v26  ;;  %1187 = vst [vmem:[%s278_s14 + $0x8] sm:$0xff] %v1184_v28 }
 0x39a   : > { %v1185_v31 = vmax.f32 %v1182_v30, 0.0 }
 0x39c   : > { %1188 = vst.msk [vmem:[%s278_s14 + $0x10] sm:$0xff] %vm327_vm0, %v1185_v31 }
 0x39d PF: > { %s17_s24 = sadd.s32 1, %s1348_s24  }
 0x39e   : > { %p14_p4 = scmp.ge.s32.totalorder %s17_s24, 4  }
 0x3a0   :  { %16 = sbr.rel (!%p14_p4) target bundleno = 1 (0x1), region = 78 }

</bundles_post_ra>
